<compile_context>
chip_gen: v7x
topology: tpu7x:2x2x1
jax: 0.10.0
libtpu: 0.0.40
codegen_flags: <defaults>
</compile_context>

<pallas_src>
import functools

import jax
import jax.numpy as jnp
from jax import lax
from jax.experimental import pallas as pl
from jax.experimental.pallas import tpu as pltpu


# ----------------------------------------------------------------------------
# Pallas kernel: fused (per-tap conv matmul -> f32 accumulate -> bias+LN).
# ----------------------------------------------------------------------------
def _patch_embed_kernel(x_ref, w_ref, b_ref, g_ref, beta_ref, o_ref, acc_ref,
                        *, num_taps, eps):
    # x_ref   : (1, tile_m, Ks)  spatial patches of one temporal source frame
    # w_ref   : (1, Ks, E)       weight slice for temporal tap kt
    # b/g/beta: (1, E)           f32 bias / LayerNorm gamma / LayerNorm beta
    # o_ref   : (1, tile_m, E)   output tile (written on the last tap)
    # acc_ref : (tile_m, E) f32  VMEM accumulator scratch
    kt = pl.program_id(2)

    @pl.when(kt == 0)
    def _init():
        acc_ref[...] = jnp.zeros_like(acc_ref)

    # Partial conv for this temporal tap: MXU matmul in the operand dtype
    # (bf16 stays on the fast path) with f32 accumulation.
    acc_ref[...] += jnp.dot(x_ref[0], w_ref[0],
                            preferred_element_type=jnp.float32)

    @pl.when(kt == num_taps - 1)
    def _finalize():
        y = acc_ref[...] + b_ref[...]                         # (tile_m, E) f32
        inv_e = 1.0 / y.shape[-1]
        mean = jnp.sum(y, axis=-1, keepdims=True) * inv_e
        yc = y - mean
        var = jnp.sum(yc * yc, axis=-1, keepdims=True) * inv_e
        inv = lax.rsqrt(var + eps)                            # EUP, ~free
        o_ref[0] = ((yc * inv) * g_ref[...] + beta_ref[...]).astype(o_ref.dtype)


def _pick_tile_rows(m, ks, e, itemsize, vmem_budget_bytes=12 * 1024 * 1024,
                    max_rows=8192):
    """Largest well-shaped row tile (multiple of 8, divides m) within budget."""
    # Per-row VMEM: double-buffered x tile + double-buffered out tile + f32 acc.
    per_row = 2 * ks * itemsize + 2 * e * itemsize + 4 * e
    cap = min(max_rows, max(8, vmem_budget_bytes // max(per_row, 1)))
    cap = max(8, (cap // 8) * 8)
    if m <= cap:
        return m
    t = cap
    while t >= 8:
        if m % t == 0:
            return t
        t -= 8
    return m  # no well-shaped divisor; fall back to the full row dim


def _fused_conv_layernorm(x_sp, w3, bias, gamma, beta, *, stride_t, t_out,
                          eps=1e-5):
    """x_sp: (Tp, M, Ks) spatially-patchified frames; w3: (kT, Ks, E).

    Returns (t_out, M, E): LayerNorm(conv_proj(x)) with rows ordered (b,h',w').
    """
    Tp, M, Ks = x_sp.shape
    kT, _, E = w3.shape

    tile_m = _pick_tile_rows(M, Ks, E, x_sp.dtype.itemsize)
    grid = (t_out, M // tile_m, kT)

    b2 = bias.reshape(1, E).astype(jnp.float32)
    g2 = gamma.reshape(1, E).astype(jnp.float32)
    bt2 = beta.reshape(1, E).astype(jnp.float32)

    kernel = functools.partial(_patch_embed_kernel, num_taps=kT, eps=eps)
    return pl.pallas_call(
        kernel,
        out_shape=jax.ShapeDtypeStruct((t_out, M, E), x_sp.dtype),
        grid_spec=pltpu.PrefetchScalarGridSpec(
            num_scalar_prefetch=0,
            grid=grid,
            in_specs=[
                # temporal source frame for (t', kt) is read directly; the
                # overlapping-window gather is never materialized in HBM.
                pl.BlockSpec((1, tile_m, Ks),
                             lambda t, m, kt: (stride_t * t + kt, m, 0)),
                pl.BlockSpec((1, Ks, E), lambda t, m, kt: (kt, 0, 0)),
                pl.BlockSpec((1, E), lambda t, m, kt: (0, 0)),
                pl.BlockSpec((1, E), lambda t, m, kt: (0, 0)),
                pl.BlockSpec((1, E), lambda t, m, kt: (0, 0)),
            ],
            out_specs=pl.BlockSpec((1, tile_m, E), lambda t, m, kt: (t, m, 0)),
            scratch_shapes=[pltpu.VMEM((tile_m, E), jnp.float32)],
        ),
        compiler_params=pltpu.CompilerParams(
            dimension_semantics=("parallel", "parallel", "arbitrary"),
            vmem_limit_bytes=32 * 1024 * 1024,
        ),
    )(x_sp, w3, b2, g2, bt2)


# ----------------------------------------------------------------------------
# Wrapper: PatchEmbed forward.
# ----------------------------------------------------------------------------
def patch_embed_forward(x, params, *, patch_size, in_ch, embed_dim,
                        compute_dtype=None, channels_last=False):
    """
    x: (B, in_ch, T, H, W)  — NCDHW, same as PyTorch.
    Returns (B, embed_dim, T', H', W')  (or (B, T', H', W', embed_dim) when
    channels_last=True for consumers that want to skip the NCDHW permute).
    """
    B, C, T, H, W = x.shape
    assert C == in_ch
    P = patch_size
    assert H % P == 0 and W % P == 0

    if in_ch == 3:
        kT, sT, pT = 3, 2, 1
    else:
        kT, sT, pT = 1, 1, 0

    Tout = (T + 2 * pT - kT) // sT + 1
    Hout, Wout = H // P, W // P
    M = B * Hout * Wout
    Ks = C * P * P
    cdt = jnp.dtype(compute_dtype) if compute_dtype is not None else x.dtype

    # Single HBM rearrangement: zero-pad T (the conv's temporal padding) and
    # fold the spatial PxP patches into the row dimension, rows = (b, h', w').
    xp = x if pT == 0 else jnp.pad(x, ((0, 0), (0, 0), (pT, pT), (0, 0), (0, 0)))
    Tp = T + 2 * pT
    xp = xp.reshape(B, C, Tp, Hout, P, Wout, P)
    x_sp = jnp.transpose(xp, (2, 0, 3, 5, 1, 4, 6)).reshape(Tp, M, Ks).astype(cdt)

    # Conv3d weight (E, C, kT, P, P) -> per-tap (kT, Ks, E); K order = (C,kH,kW)
    # matches the x_sp flattening above.  Tiny tensor, done in plain JAX.
    w3 = jnp.transpose(params["proj_w"], (2, 1, 3, 4, 0)).reshape(kT, Ks, embed_dim)
    w3 = w3.astype(cdt)

    out = _fused_conv_layernorm(
        x_sp, w3, params["proj_b"], params["ln_g"], params["ln_b"],
        stride_t=sT, t_out=Tout)                       # (Tout, M, E)

    out = out.reshape(Tout, B, Hout, Wout, embed_dim)
    if channels_last:
        return jnp.transpose(out, (1, 0, 2, 3, 4))     # (B, T', H', W', E)
    return jnp.transpose(out, (1, 4, 0, 2, 3))         # (B, E, T', H', W')


# ----------------------------------------------------------------------------
# Pure-JAX reference (lax.conv_general_dilated + LayerNorm) for verification.
# ----------------------------------------------------------------------------
def patch_embed_reference(x, params, *, patch_size, in_ch, embed_dim):
    P = patch_size
    if in_ch == 3:
        strides, padding = (2, P, P), ((1, 1), (0, 0), (0, 0))
    else:
        strides, padding = (1, P, P), ((0, 0), (0, 0), (0, 0))
    y = lax.conv_general_dilated(
        x, params["proj_w"], window_strides=strides, padding=padding,
        dimension_numbers=("NCDHW", "OIDHW", "NCDHW"),
    ) + params["proj_b"][None, :, None, None, None]
    yt = jnp.moveaxis(y, 1, -1)                        # (B, T', H', W', E)
    mean = jnp.mean(yt, axis=-1, keepdims=True)
    var = jnp.mean((yt - mean) ** 2, axis=-1, keepdims=True)
    yn = (yt - mean) / jnp.sqrt(var + 1e-5)
    yn = yn * params["ln_g"] + params["ln_b"]
    return jnp.moveaxis(yn, -1, 1)


# ----------------------------------------------------------------------------
# Deterministic parameter init (synthetic; shapes from the module __init__).
# ----------------------------------------------------------------------------
def init_params(key, *, patch_size, in_ch, embed_dim):
    kT = 3 if in_ch == 3 else 1
    k1, k2, k3, k4 = jax.random.split(key, 4)
    fan_in = in_ch * kT * patch_size * patch_size
    bound = 1.0 / jnp.sqrt(fan_in)
    return {
        "proj_w": jax.random.uniform(
            k1, (embed_dim, in_ch, kT, patch_size, patch_size),
            minval=-bound, maxval=bound, dtype=jnp.float32),
        "proj_b": jax.random.uniform(
            k2, (embed_dim,), minval=-bound, maxval=bound, dtype=jnp.float32),
        "ln_g": 1.0 + 0.1 * jax.random.normal(k3, (embed_dim,), dtype=jnp.float32),
        "ln_b": 0.1 * jax.random.normal(k4, (embed_dim,), dtype=jnp.float32),
    }


if __name__ == "__main__":
    key = jax.random.PRNGKey(0)

    # --- config 1: in_ch == 3 branch (temporal kernel 3, stride 2, pad 1) ---
    patch_size, in_ch, embed_dim = 4, 3, 32
    B, T, H, W = 2, 4, 16, 16
    kx, kp, key = jax.random.split(key, 3)
    x = jax.random.normal(kx, (B, in_ch, T, H, W), dtype=jnp.float32)
    params = init_params(kp, patch_size=patch_size, in_ch=in_ch, embed_dim=embed_dim)

    fwd = jax.jit(functools.partial(
        patch_embed_forward, patch_size=patch_size, in_ch=in_ch, embed_dim=embed_dim))
    out = jax.block_until_ready(fwd(x, params))
    ref = patch_embed_reference(
        x, params, patch_size=patch_size, in_ch=in_ch, embed_dim=embed_dim)
    assert out.shape == ref.shape == (B, embed_dim, 2, H // patch_size, W // patch_size)
    assert jnp.allclose(out, ref, atol=5e-4, rtol=5e-4), "f32 mismatch vs reference"

    # bf16 fast path (native MXU bf16 operands, bf16 stores); looser tolerance.
    out_bf16 = jax.block_until_ready(fwd(x.astype(jnp.bfloat16), params))
    assert out_bf16.dtype == jnp.bfloat16
    assert jnp.allclose(out_bf16.astype(jnp.float32), ref, atol=1e-1, rtol=1e-1), \
        "bf16 mismatch vs reference"

    # --- config 2: in_ch != 3 branch (temporal kernel 1, stride 1, no pad) ---
    patch_size2, in_ch2, embed_dim2 = 4, 8, 32
    kx2, kp2, key = jax.random.split(key, 3)
    x2 = jax.random.normal(kx2, (B, in_ch2, T, H, W), dtype=jnp.float32)
    params2 = init_params(kp2, patch_size=patch_size2, in_ch=in_ch2,
                          embed_dim=embed_dim2)
    fwd2 = jax.jit(functools.partial(
        patch_embed_forward, patch_size=patch_size2, in_ch=in_ch2,
        embed_dim=embed_dim2))
    out2 = jax.block_until_ready(fwd2(x2, params2))
    ref2 = patch_embed_reference(
        x2, params2, patch_size=patch_size2, in_ch=in_ch2, embed_dim=embed_dim2)
    assert out2.shape == ref2.shape == (B, embed_dim2, T, H // patch_size2, W // patch_size2)
    assert jnp.allclose(out2, ref2, atol=5e-4, rtol=5e-4), "kT=1 branch mismatch"

    print("KERNEL_OK")
</pallas_src>

<mosaic_0001>
module attributes {stable_mosaic.version = 11 : i64} {
  func.func @_patch_embed_kernel(%arg0: i32, %arg1: i32, %arg2: i32, %arg3: memref<1x32x48xf32, #tpu.memory_space<vmem>>, %arg4: memref<1x48x32xf32, #tpu.memory_space<vmem>>, %arg5: memref<1x32xf32, #tpu.memory_space<vmem>>, %arg6: memref<1x32xf32, #tpu.memory_space<vmem>>, %arg7: memref<1x32xf32, #tpu.memory_space<vmem>>, %arg8: memref<1x32x32xf32, #tpu.memory_space<vmem>>, %arg9: memref<32x32xf32, #tpu.memory_space<vmem>>) attributes {dimension_semantics = [#tpu.dimension_semantics<parallel>, #tpu.dimension_semantics<parallel>, #tpu.dimension_semantics<arbitrary>], iteration_bounds = array<i64: 2, 1, 3>, scalar_prefetch = 0 : i64, scratch_operands = 1 : i64, tpu.core_type = #tpu.core_type<tc>, window_params = [{transform_indices = @transform_0, window_bounds = array<i64: 1, 32, 48>}, {transform_indices = @transform_1, window_bounds = array<i64: 1, 48, 32>}, {pipeline_mode = #tpu.pipeline_mode<synchronous>, transform_indices = @transform_2, window_bounds = array<i64: 1, 32>}, {pipeline_mode = #tpu.pipeline_mode<synchronous>, transform_indices = @transform_3, window_bounds = array<i64: 1, 32>}, {pipeline_mode = #tpu.pipeline_mode<synchronous>, transform_indices = @transform_4, window_bounds = array<i64: 1, 32>}, {transform_indices = @transform_5, window_bounds = array<i64: 1, 32, 32>}]} {
    %c0_i32 = arith.constant 0 : i32
    %0 = arith.cmpi eq, %arg2, %c0_i32 : i32
    %1 = arith.extui %0 : i1 to i32
    %c0_i32_0 = arith.constant 0 : i32
    %2 = arith.cmpi ne, %1, %c0_i32_0 : i32
    scf.if %2 {
      %cst_11 = arith.constant 0.000000e+00 : f32
      %14 = vector.broadcast %cst_11 : f32 to vector<32x32xf32>
      %c0_12 = arith.constant 0 : index
      %c0_13 = arith.constant 0 : index
      %15 = vector.load %arg9[%c0_12, %c0_13] : memref<32x32xf32, #tpu.memory_space<vmem>>, vector<32x32xf32>
      tpu.vector_store %arg9[%c0_12, %c0_13], %14 {strides = array<i32>} : memref<32x32xf32, #tpu.memory_space<vmem>>, vector<32x32xf32>,
    } else {
    }
    %c0 = arith.constant 0 : index
    %c0_1 = arith.constant 0 : index
    %3 = vector.load %arg9[%c0, %c0_1] : memref<32x32xf32, #tpu.memory_space<vmem>>, vector<32x32xf32>
    %c0_2 = arith.constant 0 : index
    %c0_3 = arith.constant 0 : index
    %c0_4 = arith.constant 0 : index
    %4 = vector.load %arg3[%c0_2, %c0_3, %c0_4] : memref<1x32x48xf32, #tpu.memory_space<vmem>>, vector<1x32x48xf32>
    %5 = vector.shape_cast %4 : vector<1x32x48xf32> to vector<32x48xf32>
    %c0_5 = arith.constant 0 : index
    %c0_6 = arith.constant 0 : index
    %c0_7 = arith.constant 0 : index
    %6 = vector.load %arg4[%c0_5, %c0_6, %c0_7] : memref<1x48x32xf32, #tpu.memory_space<vmem>>, vector<1x48x32xf32>
    %7 = vector.shape_cast %6 : vector<1x48x32xf32> to vector<48x32xf32>
    %cst = arith.constant dense<0.000000e+00> : vector<32x32xf32>
    %8 = tpu.matmul %5, %7, %cst {dimension_numbers = #tpu.dot_dimension_numbers<[1], [0], [0], [1], [0, 0, 1, 1], [], []>} : vector<32x48xf32>, vector<48x32xf32>, vector<32x32xf32> -> vector<32x32xf32>
    %9 = arith.addf %3, %8 : vector<32x32xf32>
    %c0_8 = arith.constant 0 : index
    %c0_9 = arith.constant 0 : index
    %10 = vector.load %arg9[%c0_8, %c0_9] : memref<32x32xf32, #tpu.memory_space<vmem>>, vector<32x32xf32>
    tpu.vector_store %arg9[%c0_8, %c0_9], %9 {strides = array<i32>} : memref<32x32xf32, #tpu.memory_space<vmem>>, vector<32x32xf32>,
    %c2_i32 = arith.constant 2 : i32
    %11 = arith.cmpi eq, %arg2, %c2_i32 : i32
    %12 = arith.extui %11 : i1 to i32
    %c0_i32_10 = arith.constant 0 : i32
    %13 = arith.cmpi ne, %12, %c0_i32_10 : i32
    scf.if %13 {
      %c0_11 = arith.constant 0 : index
      %c0_12 = arith.constant 0 : index
      %14 = vector.load %arg9[%c0_11, %c0_12] : memref<32x32xf32, #tpu.memory_space<vmem>>, vector<32x32xf32>
      %c0_13 = arith.constant 0 : index
      %c0_14 = arith.constant 0 : index
      %15 = vector.load %arg5[%c0_13, %c0_14] : memref<1x32xf32, #tpu.memory_space<vmem>>, vector<1x32xf32>
      %16 = vector.broadcast %15 : vector<1x32xf32> to vector<32x32xf32>
      %17 = arith.addf %14, %16 : vector<32x32xf32>
      %cst_15 = arith.constant dense<0.000000e+00> : vector<32xf32>
      %18 = vector.multi_reduction <add>, %17, %cst_15 [1] : vector<32x32xf32> to vector<32xf32>
      %19 = vector.shape_cast %18 : vector<32xf32> to vector<32x1xf32>
      %cst_16 = arith.constant 3.125000e-02 : f32
      %20 = vector.broadcast %cst_16 : f32 to vector<32x1xf32>
      %21 = arith.mulf %19, %20 : vector<32x1xf32>
      %22 = vector.broadcast %21 : vector<32x1xf32> to vector<32x32xf32>
      %23 = arith.subf %17, %22 : vector<32x32xf32>
      %24 = arith.mulf %23, %23 : vector<32x32xf32>
      %cst_17 = arith.constant dense<0.000000e+00> : vector<32xf32>
      %25 = vector.multi_reduction <add>, %24, %cst_17 [1] : vector<32x32xf32> to vector<32xf32>
      %26 = vector.shape_cast %25 : vector<32xf32> to vector<32x1xf32>
      %cst_18 = arith.constant 3.125000e-02 : f32
      %27 = vector.broadcast %cst_18 : f32 to vector<32x1xf32>
      %28 = arith.mulf %26, %27 : vector<32x1xf32>
      %cst_19 = arith.constant 9.99999974E-6 : f32
      %29 = vector.broadcast %cst_19 : f32 to vector<32x1xf32>
      %30 = arith.addf %28, %29 : vector<32x1xf32>
      %31 = math.rsqrt %30 : vector<32x1xf32>
      %32 = vector.broadcast %31 : vector<32x1xf32> to vector<32x32xf32>
      %33 = arith.mulf %23, %32 : vector<32x32xf32>
      %c0_20 = arith.constant 0 : index
      %c0_21 = arith.constant 0 : index
      %34 = vector.load %arg6[%c0_20, %c0_21] : memref<1x32xf32, #tpu.memory_space<vmem>>, vector<1x32xf32>
      %35 = vector.broadcast %34 : vector<1x32xf32> to vector<32x32xf32>
      %36 = arith.mulf %33, %35 : vector<32x32xf32>
      %c0_22 = arith.constant 0 : index
      %c0_23 = arith.constant 0 : index
      %37 = vector.load %arg7[%c0_22, %c0_23] : memref<1x32xf32, #tpu.memory_space<vmem>>, vector<1x32xf32>
      %38 = vector.broadcast %37 : vector<1x32xf32> to vector<32x32xf32>
      %39 = arith.addf %36, %38 : vector<32x32xf32>
      %c0_24 = arith.constant 0 : index
      %c0_25 = arith.constant 0 : index
      %c0_26 = arith.constant 0 : index
      %40 = vector.load %arg8[%c0_24, %c0_25, %c0_26] : memref<1x32x32xf32, #tpu.memory_space<vmem>>, vector<1x32x32xf32>
      %41 = vector.shape_cast %40 : vector<1x32x32xf32> to vector<32x32xf32>
      %42 = vector.shape_cast %39 : vector<32x32xf32> to vector<1x32x32xf32>
      tpu.vector_store %arg8[%c0_24, %c0_25, %c0_26], %42 {strides = array<i32>} : memref<1x32x32xf32, #tpu.memory_space<vmem>>, vector<1x32x32xf32>,
    } else {
    }
    return
  }
  func.func @transform_0(%arg0: i32, %arg1: i32, %arg2: i32) -> (i32, i32, i32) {
    %c2_i32 = arith.constant 2 : i32
    %0 = arith.muli %c2_i32, %arg0 : i32
    %1 = arith.addi %0, %arg2 : i32
    %c0_i32 = arith.constant 0 : i32
    %c0_i32_0 = arith.constant 0 : i32
    return %1, %arg1, %c0_i32 : i32, i32, i32
  }
  func.func @transform_1(%arg0: i32, %arg1: i32, %arg2: i32) -> (i32, i32, i32) {
    %c0_i32 = arith.constant 0 : i32
    %c0_i32_0 = arith.constant 0 : i32
    %c0_i32_1 = arith.constant 0 : i32
    return %arg2, %c0_i32, %c0_i32_0 : i32, i32, i32
  }
  func.func @transform_2(%arg0: i32, %arg1: i32, %arg2: i32) -> (i32, i32) {
    %c0_i32 = arith.constant 0 : i32
    %c0_i32_0 = arith.constant 0 : i32
    %c0_i32_1 = arith.constant 0 : i32
    return %c0_i32, %c0_i32_0 : i32, i32
  }
  func.func @transform_3(%arg0: i32, %arg1: i32, %arg2: i32) -> (i32, i32) {
    %c0_i32 = arith.constant 0 : i32
    %c0_i32_0 = arith.constant 0 : i32
    %c0_i32_1 = arith.constant 0 : i32
    return %c0_i32, %c0_i32_0 : i32, i32
  }
  func.func @transform_4(%arg0: i32, %arg1: i32, %arg2: i32) -> (i32, i32) {
    %c0_i32 = arith.constant 0 : i32
    %c0_i32_0 = arith.constant 0 : i32
    %c0_i32_1 = arith.constant 0 : i32
    return %c0_i32, %c0_i32_0 : i32, i32
  }
  func.func @transform_5(%arg0: i32, %arg1: i32, %arg2: i32) -> (i32, i32, i32) {
    %c0_i32 = arith.constant 0 : i32
    %c0_i32_0 = arith.constant 0 : i32
    return %arg0, %arg1, %c0_i32 : i32, i32, i32
  }
}

</mosaic_0001>

<bundles_post_ra>
// kernel: patch_embed_forward.1
= control target key start
LH: loop header
LB: loop body
LE: loop exit
PB: predicated region body
PF: predicated region fallthrough
CT: control target
= control target key end

     0   :  { %s830_s18 = smov 0   ;;  %s832_s19 = smov 0   ;;  %s932_s0 = inlined_call_operand.vmem [shape: f32[6,32,48], index: 0, kind: input, shape index: {}]   ;;  %s933_s1 = inlined_call_operand.vmem [shape: f32[3,48,32], index: 1, kind: input, shape index: {}]   ;;  %s934_s2 = inlined_call_operand.vmem [shape: f32[1,32], index: 2, kind: input, shape index: {}]   ;;  %s935_s3 = inlined_call_operand.vmem [shape: f32[1,32], index: 3, kind: input, shape index: {}]   ;;  %s936_s4 = inlined_call_operand.vmem [shape: f32[1,32], index: 4, kind: input, shape index: {}]   ;;  %s937_s5 = inlined_call_operand.vmem [shape: f32[2,32,32], index: 5, kind: output, shape index: {}]  }
   0x1   :  { %s834_s20 = smov 0   ;;  %s836_s21 = smov 0  }
   0x2   :  { %s838_s22 = smov 0  }
   0x3 LB: > { %s27_s23 = sadd.s32 1, %s789_s20  ;;  %s34_s24 = sadd.s32 1, %s793_s21  ;;  %s797_s22 = sphi %s838_s22, %s15_s22   ;;  %s793_s21 = sphi %s836_s21, %s941_s21   ;;  %s789_s20 = sphi %s834_s20, %s940_s20   ;;  %s785_s19 = sphi %s832_s19, %s939_s19   ;;  %s781_s18 = sphi %s830_s18, %s938_s18  }
   0x4   : > { %p28_p0 = scmp.ge.s32.totalorder %s27_s23, 3  ;;  %p643_p1 = scmp.ge.s32.totalorder %s797_s22, 1 }
   0x5   : > { %p233_p2 = scmp.lt.s32.totalorder %s797_s22, 7 }
   0x6   : > { %s943_s23 = smov (%p28_p0, %s27_s23), 0  ;;  %s945_s24 = smov (!%p28_p0, %s34_s24), %s793_s21 }
   0x7   : > { %p234_p3 = pnand %p643_p1, %p233_p2  ;;  %p36_p4 = scmp.ge.s32.totalorder %s945_s24, 2 }
   0x8   : > { %s644_s25 = sshll.u32 (!%p234_p3), %s785_s19, 1  ;;  %p290_p5 = scmp.lt.s32.totalorder (!%p234_p3), %s781_s18, 2 }
   0x9   : > { %s947_s24 = smov (%p36_p4, %s945_s24), 0  ;;  %237 = sbr.rel (%p234_p3) target bundleno = 590 (0x24e), region = 40 }
   0xa   : > { %s277_s26 = sadd.s32 (!%p234_p3), %s781_s18, %s644_s25  ;;  %p296_p7 = scmp.lt.s32.totalorder (!%p234_p3), %s785_s19, 1 }
   0xb   : > { %p279_p6 = scmp.lt.s32.totalorder (!%p234_p3), %s277_s26, 5  ;;  %p650_p8 = scmp.ne.s32.totalorder (!%p234_p3), %s781_s18, 0 }
  0x10   : > { %s291_s27 = scalar_select %p290_p5, %s781_s18, 2 }
  0x11   : > { %s949_s26 = smov (!%p279_p6, %s277_s26), 5  ;;  %s951_s19 = smov (!%p296_p7, %s785_s19), 1 }
  0x12   : > { %s709_s28 = smul.u32 48, %s291_s27  ;;  %s661_s29 = sshll.u32 %s949_s26, 5  ;;  %vm309_vm0 = vcmask (!%p650_p8), 261120   ;;  %v799_v0 = vmov (!%p650_p8), 0.0  }
  0x13   : > { %s868_s7 = scalar_lea.vmem %s932_s0, %s661_s29  ;;  %s662_s11 = sshll.u32 %s951_s19, 5  ;;  %310 = vst.msk [vmem:[#allocation2] sm:$0xff] (!%p650_p8), %vm309_vm0, %v799_v0  ;;  %311 = vst.msk [vmem:[#allocation2 + $0x8] sm:$0xff] (!%p650_p8), %vm309_vm0, %v799_v0 }
  0x14   : > { %s294_s10 = scalar_lea.vmem %s933_s1, %s709_s28  ;;  %s876_s14 = scalar_lea.vmem %s937_s5, %s662_s11  ;;  %312 = vst.msk [vmem:[#allocation2 + $0x10] sm:$0xff] (!%p650_p8), %vm309_vm0, %v799_v0  ;;  %313 = vst.msk [vmem:[#allocation2 + $0x18] sm:$0xff] (!%p650_p8), %vm309_vm0, %v799_v0 }
  0x15   : > { %308 = sbr.rel (%p650_p8) target bundleno = 28 (0x1c), region = 44 }
  0x1c PF: > { %v322_v1 = vld [vmem:[%s294_s10] sm:$0xff]  ;;  %v323_v2 = vld [vmem:[%s294_s10 + $0x8] sm:$0xff]  ;;  %v324_v3 = vld [vmem:[%s294_s10 + $0x10] sm:$0xff]  ;;  %vm328_vm1 = vcmask 392192   ;;  %vm430_vm2 = vcmask 261120   ;;  %p655_p9 = scmp.ne.s32.totalorder %s781_s18, 2 }
  0x1d   : > { %v691_v4 = vpack.c.bf16 %v323_v2, %v322_v1  ;;  %v325_v5 = vld [vmem:[%s294_s10 + $0x18] sm:$0xff]  ;;  %v326_v7 = vld [vmem:[%s294_s10 + $0x20] sm:$0xff]  ;;  %v327_v8 = vld [vmem:[%s294_s10 + $0x28] sm:$0xff] }
  0x1e   : > { %v695_v6 = vpack.c.bf16 %v325_v5, %v324_v3  ;;  %v318_v9 = vld [vmem:[%s868_s7] sm:$0xff]  ;;  %v320_v10 = vld [vmem:[%s868_s7 + $0x10] sm:$0xff]  ;;  %v699_v11 = vpack.c.bf16 %v327_v8, %v326_v7  ;;  %v319_v12 = vld [vmem:[%s868_s7 + $0x8] sm:$0xff] }
  0x1f   : > { %692 = vmatprep.subr.bf16.mxu0 %v691_v4  ;;  %703 = vmatprep.subr.bf16.mxu1 %v691_v4  ;;  %v321_v13 = vld [vmem:[%s868_s7 + $0x18] sm:$0xff]  ;;  %v315_v14 = vld [vmem:[#allocation2 + $0x8] sm:$0xff]  ;;  %v314_v16 = vld [vmem:[#allocation2] sm:$0xff] }
  0x20   : > { %694 = vmatpush3.bf16.msra.mxu0 %v691_v4  ;;  %706 = vmatpush3.bf16.msra.mxu1 %v691_v4  ;;  %v317_v15 = vld [vmem:[#allocation2 + $0x18] sm:$0xff]  ;;  %v316_v17 = vld [vmem:[#allocation2 + $0x10] sm:$0xff]  ;;  %v656_v27 = vld [vmem:[%s934_s2] ss:$0 sm:$0xff] (!%p655_p9) }
  0x21   : > { %696 = vmatprep.subr.bf16.mxu0 %v695_v6  ;;  %704 = vmatprep.subr.bf16.mxu1 %v695_v6  ;;  %v657_v8 = vld [vmem:[%s935_s3] ss:$0 sm:$0xff] (!%p655_p9) }
  0x22   : > { %685 = vmatprep.mubr.msk.f32.mxu0 %vm328_vm1, %v318_v9  ;;  %688 = vmatprep.mubr.msk.f32.mxu1 %vm328_vm1, %v320_v10  ;;  %v658_v10 = vld [vmem:[%s936_s4] ss:$0 sm:$0xff] (!%p655_p9) }
  0x24   : > { %698 = vmatpush3.bf16.msra.mxu0 %v695_v6  ;;  %707 = vmatpush3.bf16.msra.mxu1 %v695_v6 }
  0x25   : > { %700 = vmatprep.subr.bf16.mxu0 %v699_v11  ;;  %705 = vmatprep.subr.bf16.mxu1 %v699_v11 }
  0x28   : > { %702 = vmatpush3.bf16.msra.mxu0 %v699_v11  ;;  %708 = vmatpush3.bf16.msra.mxu1 %v699_v11 }
  0x2b   : > { %686 = vmatmul.mubr.msk.f32.vlgmr.msra.gmra.mrb[0].mxu0 %vm328_vm1, %v319_v12  ;;  %689 = vmatmul.mubr.msk.f32.vlgmr.msra.gmra.mrb[0].mxu1 %vm328_vm1, %v321_v13 }
  0xfc   : > { %438 = sbr.rel (%p655_p9) target bundleno = 590 (0x24e), region = 48 }
  0xfe   : > { %v687_v18 = vpop.f32.mrb[0].mxu0  ;;  %v690_v19 = vpop.f32.mrb[0].mxu1 }
  0xff   : > { %v427_v20 = vadd.f32 %v687_v18, %v315_v14  ;;  %v429_v21 = vadd.f32 %v690_v19, %v317_v15  ;;  %v407_v22 = vpop.f32.mrb[1].mxu0  ;;  %v417_v23 = vpop.f32.mrb[1].mxu1 }
 0x100   : > { %v426_v24 = vadd.f32 %v407_v22, %v314_v16  ;;  %v428_v25 = vadd.f32 %v417_v23, %v316_v17 }
 0x101   : > { %432 = vst.msk [vmem:[#allocation2 + $0x8] sm:$0xff] %vm430_vm2, %v427_v20  ;;  %434 = vst.msk [vmem:[#allocation2 + $0x18] sm:$0xff] %vm430_vm2, %v429_v21 }
 0x102   : > { %431 = vst.msk [vmem:[#allocation2] sm:$0xff] %vm430_vm2, %v426_v24  ;;  %433 = vst.msk [vmem:[#allocation2 + $0x10] sm:$0xff] %vm430_vm2, %v428_v25 }
 0x108   : > { %v440_v31 = vld [vmem:[#allocation2 + $0x8] sm:$0xff]  ;;  %v442_v32 = vld [vmem:[#allocation2 + $0x18] sm:$0xff] }
 0x109   : > { %v439_v26 = vld [vmem:[#allocation2] sm:$0xff]  ;;  %v441_v28 = vld [vmem:[#allocation2 + $0x10] sm:$0xff]  ;;  %v451_v33 = vadd.f32 %v656_v27, %v440_v31  ;;  %v453_v34 = vadd.f32 %v656_v27, %v442_v32 }
 0x10a   : > { %v450_v29 = vadd.f32 %v656_v27, %v439_v26  ;;  %v452_v30 = vadd.f32 %v656_v27, %v441_v28 }
 0x10b   : > { %v457_v37 = vsel %vm430_vm2, %v451_v33, 0.0  ;;  %v463_v38 = vsel %vm430_vm2, %v453_v34, 0.0 }
 0x10c   : > { %v454_v35 = vsel %vm430_vm2, %v450_v29, 0.0  ;;  %v460_v36 = vsel %vm430_vm2, %v452_v30, 0.0 }
 0x10d   : > { %455 = vadd.xlane.f32.xlu0 %v454_v35  ;;  %461 = vadd.xlane.f32.xlu1 %v460_v36 }
 0x111   : > { %458 = vadd.xlane.f32.xlu0 %v457_v37  ;;  %464 = vadd.xlane.f32.xlu1 %v463_v38 }
 0x19a   : > { %v456_v39 = vpop.xlane.xlu0 %455  ;;  %v462_v40 = vpop.xlane.xlu1 %461 }
 0x19b   : > { %v466_v41 = vmul.f32 0.03125, %v456_v39  ;;  %v468_v42 = vmul.f32 0.03125, %v462_v40 }
 0x19d   : > { %v470_v43 = vsub.f32 %v450_v29, %v466_v41  ;;  %v472_v44 = vsub.f32 %v452_v30, %v468_v42 }
 0x19e   : > { %v459_v45 = vpop.xlane.xlu0 %458  ;;  %v465_v46 = vpop.xlane.xlu1 %464 }
 0x19f   : > { %v467_v47 = vmul.f32 0.03125, %v459_v45  ;;  %v469_v48 = vmul.f32 0.03125, %v465_v46  ;;  %v474_v49 = vmul.f32 %v470_v43, %v470_v43  ;;  %v476_v50 = vmul.f32 %v472_v44, %v472_v44 }
 0x1a1   : > { %v471_v51 = vsub.f32 %v451_v33, %v467_v47  ;;  %v473_v52 = vsub.f32 %v453_v34, %v469_v48  ;;  %v478_v53 = vsel %vm430_vm2, %v474_v49, 0.0  ;;  %v484_v54 = vsel %vm430_vm2, %v476_v50, 0.0 }
 0x1a2   : > { %479 = vadd.xlane.f32.xlu0 %v478_v53 }
 0x1a3   : > { %v475_v55 = vmul.f32 %v471_v51, %v471_v51  ;;  %v477_v56 = vmul.f32 %v473_v52, %v473_v52 }
 0x1a5   : > { %v481_v57 = vsel %vm430_vm2, %v475_v55, 0.0  ;;  %v487_v58 = vsel %vm430_vm2, %v477_v56, 0.0 }
 0x1a6   : > { %485 = vadd.xlane.f32.xlu0 %v484_v54  ;;  %482 = vadd.xlane.f32.xlu1 %v481_v57 }
 0x1aa   : > { %488 = vadd.xlane.f32.xlu1 %v487_v58 }
 0x22f   : > { %v480_v59 = vpop.xlane.xlu0 %479 }
 0x230   : > { %v490_v60 = vmul.f32 0.03125, %v480_v59 }
 0x232   : > { %v494_v61 = vadd.f32 1e-05, %v490_v60 }
 0x233   : > { %v483_v62 = vpop.xlane.xlu1 %482  ;;  %v486_v63 = vpop.xlane.xlu0 %485 }
 0x234   : > { %751 = vrsqrt.f32 %v494_v61  ;;  %v491_v0 = vmul.f32 0.03125, %v483_v62  ;;  %v492_v1 = vmul.f32 0.03125, %v486_v63 }
 0x236   : > { %v495_v2 = vadd.f32 1e-05, %v491_v0  ;;  %v496_v3 = vadd.f32 1e-05, %v492_v1 }
 0x237   : > { %v489_v4 = vpop.xlane.xlu1 %488 }
 0x238   : > { %753 = vrsqrt.f32 %v495_v2  ;;  %v493_v5 = vmul.f32 0.03125, %v489_v4 }
 0x239   : > { %755 = vrsqrt.f32 %v496_v3 }
 0x23a   : > { %v497_v6 = vadd.f32 1e-05, %v493_v5 }
 0x23c   : > { %757 = vrsqrt.f32 %v497_v6 }
 0x23e   : > { %v752_v7 = vpop.eup %751 }
 0x23f   : > { %v502_v9 = vmul.f32 %v752_v7, %v470_v43 }
 0x241   : > { %v513_v11 = vmul.f32 %v657_v8, %v502_v9 }
 0x242   : > { %v754_v12 = vpop.eup %753 }
 0x243   : > { %v756_v13 = vpop.eup %755  ;;  %v524_v14 = vadd.f32 %v658_v10, %v513_v11  ;;  %v503_v15 = vmul.f32 %v754_v12, %v471_v51 }
 0x244   : > { %v504_v16 = vmul.f32 %v756_v13, %v472_v44 }
 0x245   : > { %528 = vst.msk [vmem:[%s876_s14] sm:$0xff] %vm430_vm2, %v524_v14  ;;  %v514_v17 = vmul.f32 %v657_v8, %v503_v15 }
 0x246   : > { %v758_v18 = vpop.eup %757  ;;  %v515_v19 = vmul.f32 %v657_v8, %v504_v16 }
 0x247   : > { %v525_v20 = vadd.f32 %v658_v10, %v514_v17  ;;  %v505_v21 = vmul.f32 %v758_v18, %v473_v52 }
 0x248   : > { %v526_v22 = vadd.f32 %v658_v10, %v515_v19 }
 0x249   : > { %529 = vst.msk [vmem:[%s876_s14 + $0x8] sm:$0xff] %vm430_vm2, %v525_v20  ;;  %v516_v23 = vmul.f32 %v657_v8, %v505_v21 }
 0x24a   : > { %530 = vst.msk [vmem:[%s876_s14 + $0x10] sm:$0xff] %vm430_vm2, %v526_v22 }
 0x24b   : > { %v527_v24 = vadd.f32 %v658_v10, %v516_v23 }
 0x24d   : > { %531 = vst.msk [vmem:[%s876_s14 + $0x18] sm:$0xff] %vm430_vm2, %v527_v24 }
 0x24e PF: > { %s15_s22 = sadd.s32 1, %s797_s22   ;;  %s938_s18 = smov %s789_s20 }
 0x24f   : > { %p12_p10 = scmp.ge.s32.totalorder %s15_s22, 8   ;;  %s939_s19 = smov %s793_s21 }
 0x250   : > { %s940_s20 = smov %s943_s23  ;;  %s941_s21 = smov %s947_s24 }
 0x251   :  { %14 = sbr.rel (!%p12_p10) target bundleno = 3 (0x3), region = 81 }

</bundles_post_ra>
